<compile_context>
chip_gen: v5e
topology: v5e:2x2
jax: 0.10.0
libtpu: 0.0.40
codegen_flags: <defaults>
</compile_context>

<pallas_src>
import numpy as np
import jax
import jax.numpy as jnp
from jax.experimental import pallas as pl
from jax.experimental.pallas import tpu as pltpu


LANE = 128
MAX_WIDTH = 64 * LANE            # widest lane slab we consider (8192)
TILE_BYTES = 4 * 1024 * 1024     # per-buffer tile budget (4 live buffers -> 16 MiB)
VMEM_LIMIT = 32 * 1024 * 1024    # explicit scoped-VMEM cap (safe on v5e/v6e/v7x)


def _copy_kernel(x_ref, o_ref):
    # identity copy of the current tile
    o_ref[...] = x_ref[...]


def _resolve_view_shape(numel: int, args):
    """Replicate torch.Tensor.view shape resolution (single -1 allowed)."""
    if len(args) == 1 and isinstance(args[0], (tuple, list)):
        args = tuple(args[0])
    args = tuple(int(a) for a in args)
    if args.count(-1) > 1:
        raise ValueError("only one dimension can be inferred (-1)")
    if -1 in args:
        known = 1
        for a in args:
            if a != -1:
                known *= a
        if known == 0 or numel % known != 0:
            raise ValueError(f"shape {args} is invalid for input of size {numel}")
        args = tuple(numel // known if a == -1 else a for a in args)
    if int(np.prod(args)) != numel:
        raise ValueError(f"shape {args} is invalid for input of size {numel}")
    return args


def _sublane_pack(dtype) -> int:
    """Native sublane packing: 8 rows/vreg for 4B, 16 for 2B, 32 for 1B dtypes."""
    itemsize = jnp.dtype(dtype).itemsize
    return max(8, 32 // max(itemsize, 1))


def _pick_width(numel: int) -> int:
    """Largest width (multiple of 128, <= MAX_WIDTH) that divides numel."""
    lane_blocks = numel // LANE
    for k in range(min(lane_blocks, MAX_WIDTH // LANE), 0, -1):
        if lane_blocks % k == 0:
            return k * LANE
    return LANE


def _pick_block_rows(rows: int, max_rows: int, pack: int) -> int:
    """Largest row-block <= max_rows, multiple of `pack`, preferring a divisor
    of `rows` so the trailing grid tile needs no store masking."""
    if rows <= max_rows:
        return rows                      # single block == full extent (always legal)
    cap = max(pack, (max_rows // pack) * pack)
    for cand in range(cap, 0, -pack):
        if rows % cand == 0:
            return cand
    return cap                           # ragged tail handled by Pallas masking


def _pallas_copy_2d(flat2d: jax.Array) -> jax.Array:
    """Identity copy of a (rows, width) array with large lane-dense tiles."""
    rows, width = flat2d.shape
    dtype = flat2d.dtype
    itemsize = jnp.dtype(dtype).itemsize
    pack = _sublane_pack(dtype)

    max_rows = max(pack, TILE_BYTES // (width * itemsize))
    block_rows = _pick_block_rows(rows, max_rows, pack)
    grid = (pl.cdiv(rows, block_rows),)

    return pl.pallas_call(
        _copy_kernel,
        out_shape=jax.ShapeDtypeStruct((rows, width), dtype),
        grid_spec=pltpu.PrefetchScalarGridSpec(
            num_scalar_prefetch=0,
            grid=grid,
            in_specs=[pl.BlockSpec((block_rows, width), lambda i: (i, 0))],
            out_specs=pl.BlockSpec((block_rows, width), lambda i: (i, 0)),
        ),
        compiler_params=pltpu.CompilerParams(
            dimension_semantics=("parallel",),
            vmem_limit_bytes=VMEM_LIMIT,
        ),
        cost_estimate=pl.CostEstimate(
            flops=0,
            transcendentals=0,
            bytes_accessed=2 * rows * width * itemsize,
        ),
    )(flat2d)


def _pallas_copy_full(flat: jax.Array) -> jax.Array:
    """Single full-extent block copy (used for small ragged element counts).

    Block shape equals the full array dims, so the (8,128) divisibility rule
    does not apply; no padding or trailing slice is needed.
    """
    n = flat.shape[0]
    itemsize = jnp.dtype(flat.dtype).itemsize
    x2d = jnp.reshape(flat, (1, n))
    out2d = pl.pallas_call(
        _copy_kernel,
        out_shape=jax.ShapeDtypeStruct((1, n), flat.dtype),
        in_specs=[pl.BlockSpec((1, n), lambda: (0, 0))],
        out_specs=pl.BlockSpec((1, n), lambda: (0, 0)),
        compiler_params=pltpu.CompilerParams(vmem_limit_bytes=VMEM_LIMIT),
        cost_estimate=pl.CostEstimate(
            flops=0, transcendentals=0, bytes_accessed=2 * n * itemsize),
    )(x2d)
    return jnp.reshape(out2d, (n,))


def tensor_view(x: jax.Array, *view_args) -> jax.Array:
    """Pallas implementation of TensorView(*view_args)(x)."""
    # TODO(synk): torch .view(dtype=...) (bit reinterpretation via kwargs) is not handled.
    numel = int(np.prod(x.shape))
    target_shape = _resolve_view_shape(numel, view_args)

    if numel == 0:
        # zero-sized pallas_call may not lower; view is metadata-only anyway.
        return jnp.reshape(x, target_shape)

    flat = jnp.reshape(x, (numel,))  # row-major == contiguous torch layout
    itemsize = jnp.dtype(x.dtype).itemsize

    if numel % LANE == 0:
        # Main path: no padding, no trailing slice -> single HBM pass in / out.
        width = _pick_width(numel)
        out2d = _pallas_copy_2d(jnp.reshape(flat, (numel // width, width)))
        return jnp.reshape(out2d, target_shape)

    if numel * itemsize <= TILE_BYTES:
        # Small ragged stream: one full-extent block, no pad / slice.
        return jnp.reshape(_pallas_copy_full(flat), target_shape)

    # Rare fallback: large and not lane-aligned.  Pad to a multiple of 128,
    # copy, then slice back (costs extra HBM passes but stays correct).
    pad = (-numel) % LANE
    flat_p = jnp.concatenate([flat, jnp.zeros((pad,), dtype=x.dtype)])
    total = numel + pad
    width = _pick_width(total)
    out2d = _pallas_copy_2d(jnp.reshape(flat_p, (total // width, width)))
    out_flat = jnp.reshape(out2d, (total,))[:numel]
    return jnp.reshape(out_flat, target_shape)


if __name__ == "__main__":
    key = jax.random.PRNGKey(0)
    # NCHW input, as a PyTorch conv feature map would be
    x = jax.random.normal(key, (2, 4, 16, 16), dtype=jnp.float32)

    # TensorView(2, -1): flatten all non-batch dims
    y = tensor_view(x, 2, -1)
    jax.block_until_ready(y)
    expected = jnp.reshape(x, (2, -1))
    assert y.shape == (2, 4 * 16 * 16), y.shape
    assert y.dtype == x.dtype
    np.testing.assert_array_equal(np.asarray(y), np.asarray(expected))

    # bf16 path (exercises the 16-row sublane packing branch)
    xb = x.astype(jnp.bfloat16)
    yb = tensor_view(xb, -1, 16)
    jax.block_until_ready(yb)
    np.testing.assert_array_equal(
        np.asarray(yb), np.asarray(jnp.reshape(xb, (-1, 16))))

    # ragged path (numel not a multiple of 128) -> full-extent single block
    xr = jax.random.normal(jax.random.PRNGKey(1), (3, 5, 7), dtype=jnp.float32)
    yr = tensor_view(xr, 105)
    jax.block_until_ready(yr)
    np.testing.assert_array_equal(
        np.asarray(yr), np.asarray(jnp.reshape(xr, (105,))))

    # multi-tile path (rows > block_rows -> grid of several tiles)
    xm = jax.random.normal(jax.random.PRNGKey(2), (8, 64, 64, 64), dtype=jnp.float32)
    ym = tensor_view(xm, 8, -1)
    jax.block_until_ready(ym)
    np.testing.assert_array_equal(
        np.asarray(ym), np.asarray(jnp.reshape(xm, (8, -1))))

    print("KERNEL_OK")
</pallas_src>

<mosaic_0001>
module attributes {stable_mosaic.version = 11 : i64} {
  func.func @_copy_kernel(%arg0: i32, %arg1: memref<1x2048xf32, #tpu.memory_space<vmem>>, %arg2: memref<1x2048xf32, #tpu.memory_space<vmem>>) attributes {dimension_semantics = [#tpu.dimension_semantics<parallel>], iteration_bounds = array<i64: 1>, scalar_prefetch = 0 : i64, scratch_operands = 0 : i64, tpu.core_type = #tpu.core_type<tc>, window_params = [{transform_indices = @transform_0, window_bounds = array<i64: 1, 2048>}, {transform_indices = @transform_1, window_bounds = array<i64: 1, 2048>}]} {
    %c0 = arith.constant 0 : index
    %c0_0 = arith.constant 0 : index
    %0 = vector.load %arg1[%c0, %c0_0] : memref<1x2048xf32, #tpu.memory_space<vmem>>, vector<1x2048xf32>
    %c0_1 = arith.constant 0 : index
    %c0_2 = arith.constant 0 : index
    %1 = vector.load %arg2[%c0_1, %c0_2] : memref<1x2048xf32, #tpu.memory_space<vmem>>, vector<1x2048xf32>
    tpu.vector_store %arg2[%c0_1, %c0_2], %0 {strides = array<i32>} : memref<1x2048xf32, #tpu.memory_space<vmem>>, vector<1x2048xf32>,
    return
  }
  func.func @transform_0(%arg0: i32) -> (i32, i32) {
    %c0_i32 = arith.constant 0 : i32
    %c0_i32_0 = arith.constant 0 : i32
    return %arg0, %c0_i32 : i32, i32
  }
  func.func @transform_1(%arg0: i32) -> (i32, i32) {
    %c0_i32 = arith.constant 0 : i32
    %c0_i32_0 = arith.constant 0 : i32
    return %arg0, %c0_i32 : i32, i32
  }
}

</mosaic_0001>

<bundles_post_ra>
// kernel: tpu_custom_call.1
= control target key start
LH: loop header
LB: loop body
LE: loop exit
PB: predicated region body
PF: predicated region fallthrough
CT: control target
= control target key end

     0   :  { %6 = vsyncpa [#allocation3], 0  ;;  %s116_s0 = inlined_call_operand.hbm [shape: f32[1,2048], index: 0, kind: input, shape index: {}]   ;;  %s117_s1 = inlined_call_operand.hbm [shape: f32[1,2048], index: 1, kind: output, shape index: {}]  }
   0x1   :  { %7 = vsyncpa [#allocation4], 0  ;;  %s13_s8 = sshll.u32 %s116_s0, 4  ;;  %s98_s9 = smov [#allocation2]   ;;  %s14_s8 = int_to_ptr.hbm [resolvable:$true] %s13_s8 }
   0x2   :  { %s15_s10 = sshll.u32 %s98_s9, 4  ;;  %s16_s10 = int_to_ptr.vmem [resolvable:$true] %s15_s10 }
   0x3   :  { %18 = dma.hbm_to_vmem [thread:$0]  %s14_s8, 256, %s16_s10, [#allocation3]  }
   0x4   :  { %94 = dma.done.wait [#allocation3], 256  }
   0x5   :  { %95 = vsyncadd [#allocation3], 4294967040  ;;  %s99_s11 = smov [#allocation5]   ;;  %s34_s15 = sshll.u32 %s117_s1, 4  ;;  %v23_v0 = vld [vmem:[#allocation2] sm:$0xff]  ;;  %v24_v1 = vld [vmem:[#allocation2 + $0x8] sm:$0xff]  ;;  %s35_s15 = int_to_ptr.hbm [resolvable:$true] %s34_s15 }
   0x6   :  { %s32_s12 = sshll.u32 %s99_s11, 4  ;;  %25 = vst [vmem:[#allocation5] sm:$0xff] %v23_v0  ;;  %s33_s12 = int_to_ptr.vmem [resolvable:$true] %s32_s12 }
   0x7   :  { %26 = vst [vmem:[#allocation5 + $0x8] sm:$0xff] %v24_v1 }
   0x8   :  { %37 = dma.vmem_to_hbm [thread:$0]  %s33_s12, 256, %s35_s15, [#allocation4]  }
   0x9   :  { %96 = dma.done.wait [#allocation4], 256  }
   0xa   :  { %97 = vsyncadd [#allocation4], 4294967040 }
   0xb   :  { %42 = vsyncpa [#allocation3], 1 }
   0xc   :  { %43 = vsyncpa [#allocation4], 1 }

</bundles_post_ra>
